<compile_context>
chip_gen: v6e
topology: v6e:2x2x1
jax: 0.10.0
libtpu: 0.0.40
codegen_flags: <defaults>
</compile_context>

<pallas_src>
import functools

import jax
import jax.numpy as jnp
from jax.experimental import pallas as pl
from jax.experimental.pallas import tpu as pltpu


# ---------------------------------------------------------------------------
# Tile-selection helpers (budget-bounded, padding-aware).
# ---------------------------------------------------------------------------
def _round_up(x, m):
    return ((x + m - 1) // m) * m


def _largest_divisor_tile(dim, cap, align):
    """Largest multiple of `align` that divides `dim` and is <= cap (or None)."""
    if dim % align != 0:
        return None
    t = (min(cap, dim) // align) * align
    while t >= align:
        if dim % t == 0:
            return t
        t -= align
    return None


def _tile_axis(dim, cap, align):
    """Pick (tile, padded_dim) with tile bounded by `cap`.

    Preference: full dim when small enough, then an aligned divisor of dim
    (no padding), then an aligned tile with zero padding.  Never silently
    falls back to an over-budget full-dimension tile."""
    if dim <= cap:
        return dim, dim
    t = _largest_divisor_tile(dim, cap, align)
    if t is not None:
        return t, dim
    d_al = _round_up(dim, align)
    n = -(-d_al // cap)
    t = _round_up(-(-d_al // n), align)
    return t, t * n


def _batch_tile(batch, target):
    """Batch tile: sublane aligned and (when possible) <= ceil(B/2) so the
    'parallel' grid axis has >= 2 tiles (v7x megacore sharding)."""
    if batch <= 8:
        return batch, batch
    cap = max(8, min(target, batch // 2))
    tm = _largest_divisor_tile(batch, cap, 8)
    if tm is not None:
        return tm, batch
    tm = max(8, min(target, _round_up(-(-batch // 2), 8)))
    return tm, _round_up(batch, tm)


# ---------------------------------------------------------------------------
# Stage 1 (init-time, cached): w_sum[0, i] = sum_h weight[h, i]
# grid = (I // TK, H // TH); reduction axis (H) last, output resident over it.
# ---------------------------------------------------------------------------
def weight_colsum_kernel(w_ref, o_ref, acc_ref):
    h = pl.program_id(1)

    @pl.when(h == 0)
    def _init():
        acc_ref[...] = jnp.zeros_like(acc_ref)

    acc_ref[...] += jnp.sum(
        w_ref[...].astype(jnp.float32), axis=0, keepdims=True
    )

    @pl.when(h == pl.num_programs(1) - 1)
    def _finalize():
        o_ref[...] = acc_ref[...].astype(o_ref.dtype)


def weight_colsum(weight, *, tile_bytes=2 << 20):
    """Column sum of the weight, computed once with a tiled Pallas kernel."""
    hidden_size, input_size = weight.shape

    TK, I_pad = _tile_axis(input_size, 2048, 128)
    th_cap = max(8, (tile_bytes // (TK * 4)) // 8 * 8)
    TH, H_pad = _tile_axis(hidden_size, th_cap, 8)
    nk, nh = I_pad // TK, H_pad // TH

    wp = weight
    if (H_pad, I_pad) != (hidden_size, input_size):
        wp = jnp.pad(weight, ((0, H_pad - hidden_size), (0, I_pad - input_size)))

    w_sum = pl.pallas_call(
        weight_colsum_kernel,
        out_shape=jax.ShapeDtypeStruct((1, I_pad), jnp.float32),
        grid_spec=pltpu.PrefetchScalarGridSpec(
            num_scalar_prefetch=0,
            grid=(nk, nh),
            in_specs=[pl.BlockSpec((TH, TK), lambda i, h: (h, i))],
            out_specs=pl.BlockSpec((1, TK), lambda i, h: (0, i)),
            scratch_shapes=[pltpu.VMEM((1, TK), jnp.float32)],
        ),
        compiler_params=pltpu.CompilerParams(
            dimension_semantics=("parallel", "arbitrary"),
            vmem_limit_bytes=48 << 20,
        ),
    )(wp)
    if I_pad != input_size:
        w_sum = w_sum[:, :input_size]
    return w_sum


# ---------------------------------------------------------------------------
# Stage 2 (forward path): out[b, 0] = alpha * dot(x[b, :], w_sum)
# grid = (B // TM, I // TK); reduction axis (K) last; store deferred to last K.
# ---------------------------------------------------------------------------
def gemv_scale_kernel(x_ref, ws_ref, o_ref, acc_ref, *, alpha, block_k,
                      ws_resident):
    k = pl.program_id(1)

    @pl.when(k == 0)
    def _init():
        acc_ref[...] = jnp.zeros_like(acc_ref)

    if ws_resident:
        # Whole w_sum lives in VMEM as (nk, TK); pick row k (sublane index).
        ws = ws_ref[pl.ds(k, 1), :]                      # (1, TK)
    else:
        ws = ws_ref[...]                                 # (1, TK) streamed tile

    x = x_ref[...].astype(jnp.float32)                   # (TM, TK)
    prod = x * ws.astype(jnp.float32)                    # (TM, TK), row-broadcast

    # Deferred cross-lane reduction: tree-add 128-wide lane chunks on the VPU
    # into a (TM, 128) accumulator; the single XLU lane-reduce is in finalize.
    if block_k % 128 == 0 and block_k > 128:
        chunks = [prod[:, j * 128:(j + 1) * 128] for j in range(block_k // 128)]
        while len(chunks) > 1:
            nxt = [a + b for a, b in zip(chunks[0::2], chunks[1::2])]
            if len(chunks) % 2:
                nxt.append(chunks[-1])
            chunks = nxt
        acc_ref[...] += chunks[0]
    else:
        acc_ref[...] += prod

    @pl.when(k == pl.num_programs(1) - 1)
    def _finalize():
        r = jnp.sum(acc_ref[...], axis=-1, keepdims=True)      # (TM, 1)
        # Single fused scale; single deferred store per batch tile.
        o_ref[...] = (alpha * r).astype(o_ref.dtype)


def fused_ops(x, weight, scaling_factor, *, w_sum=None, tm=512,
              x_tile_bytes=4 << 20):
    """Pallas TPU implementation of fused matmul + /2 + sum(dim=1) + scale."""
    batch_size, input_size = x.shape
    if w_sum is None:
        # Not cached by the caller: reduce the constant weight once (stage 1).
        assert weight.shape[1] == input_size, (x.shape, weight.shape)
        w_sum = weight_colsum(weight)
    w_sum = w_sum.astype(jnp.float32)

    # --- tile selection -----------------------------------------------------
    TM, B_pad = _batch_tile(batch_size, tm)
    tk_cap = max(128, (x_tile_bytes // (TM * 4)) // 128 * 128)
    TK, I_pad = _tile_axis(input_size, tk_cap, 128)
    nb, nk = B_pad // TM, I_pad // TK

    # --- zero-padding only when shapes are not tileable as-is ---------------
    xp = x
    if (B_pad, I_pad) != (batch_size, input_size):
        xp = jnp.pad(x, ((0, B_pad - batch_size), (0, I_pad - input_size)))
    wsp = w_sum
    if I_pad != input_size:
        wsp = jnp.pad(w_sum, ((0, 0), (0, I_pad - input_size)))
    wsp = wsp.reshape(nk, TK)

    # Keep the whole (tiny) column-sum vector resident in VMEM unless it is
    # unusually large; resident => constant index_map => zero repeat DMAs.
    ws_resident = (I_pad * 4 * 2) <= (4 << 20)
    if ws_resident:
        ws_spec = pl.BlockSpec((nk, TK), lambda i, k: (0, 0))
    else:
        ws_spec = pl.BlockSpec((1, TK), lambda i, k: (k, 0))

    acc_w = 128 if TK % 128 == 0 else TK
    alpha = 0.5 * float(scaling_factor)
    kernel = functools.partial(gemv_scale_kernel, alpha=alpha, block_k=TK,
                               ws_resident=ws_resident)

    out = pl.pallas_call(
        kernel,
        out_shape=jax.ShapeDtypeStruct((B_pad, 1), x.dtype),
        grid_spec=pltpu.PrefetchScalarGridSpec(
            num_scalar_prefetch=0,
            grid=(nb, nk),
            in_specs=[
                pl.BlockSpec((TM, TK), lambda i, k: (i, k)),   # stream x tiles
                ws_spec,                                       # resident w_sum
            ],
            out_specs=pl.BlockSpec((TM, 1), lambda i, k: (i, 0)),
            scratch_shapes=[pltpu.VMEM((TM, acc_w), jnp.float32)],
        ),
        compiler_params=pltpu.CompilerParams(
            dimension_semantics=("parallel", "arbitrary"),
            # Above the 16/32 MiB scoped defaults (big tiles need ~10-15 MiB),
            # below v7x's 64 MiB physical VMEM so headroom remains.
            vmem_limit_bytes=48 << 20,
        ),
    )(xp, wsp)

    if B_pad != batch_size:
        out = out[:batch_size]
    return out


class ModelNew:
    """JAX/Pallas port of the PyTorch ModelNew (Gemm + Divide + Sum + Scale)."""

    def __init__(self, input_size, hidden_size, scaling_factor, key):
        # torch.randn-equivalent deterministic init
        self.weight = jax.random.normal(
            key, (hidden_size, input_size), dtype=jnp.float32)
        self.scaling_factor = float(scaling_factor)
        # Weight is constant => hoist the stage-1 column sum out of the
        # forward path and cache it (computed once with the Pallas kernel).
        self.w_sum = jax.block_until_ready(weight_colsum(self.weight))

    def __call__(self, x):
        return fused_ops(x, self.weight, self.scaling_factor, w_sum=self.w_sum)


if __name__ == "__main__":
    def check(batch_size, input_size, hidden_size, scaling_factor, key):
        kx, kw = jax.random.split(key)
        x = jax.random.normal(kx, (batch_size, input_size), dtype=jnp.float32)
        model = ModelNew(input_size, hidden_size, scaling_factor, kw)
        out = jax.block_until_ready(model(x))

        # reference in plain JAX (matmul-then-divide-then-sum order)
        ref = (jnp.sum(x @ model.weight.T / 2.0, axis=1, keepdims=True)
               * scaling_factor)
        assert out.shape == (batch_size, 1), out.shape
        # NOTE: the colsum-then-dot rewrite changes fp summation order; f32
        # accumulation keeps it within ~1e-4 of the reference for f32 inputs.
        assert jnp.allclose(out, ref, rtol=1e-4, atol=1e-4), (out, ref)

    key = jax.random.PRNGKey(0)
    k1, k2 = jax.random.split(key)
    check(8, 32, 16, 2.0, k1)       # tiny, single-tile path
    check(20, 200, 12, 1.5, k2)     # non-divisible shapes -> padded-tile path

    print("KERNEL_OK")
</pallas_src>

<mosaic_0001>
module attributes {stable_mosaic.version = 11 : i64} {
  func.func @weight_colsum_kernel(%arg0: i32, %arg1: i32, %arg2: memref<16x32xf32, #tpu.memory_space<vmem>>, %arg3: memref<1x32xf32, #tpu.memory_space<vmem>>, %arg4: memref<1x32xf32, #tpu.memory_space<vmem>>) attributes {dimension_semantics = [#tpu.dimension_semantics<parallel>, #tpu.dimension_semantics<arbitrary>], iteration_bounds = array<i64: 1, 1>, scalar_prefetch = 0 : i64, scratch_operands = 1 : i64, tpu.core_type = #tpu.core_type<tc>, window_params = [{transform_indices = @transform_0, window_bounds = array<i64: 16, 32>}, {transform_indices = @transform_1, window_bounds = array<i64: 1, 32>}]} {
    %c0_i32 = arith.constant 0 : i32
    %0 = arith.cmpi eq, %arg1, %c0_i32 : i32
    %1 = arith.extui %0 : i1 to i32
    %c0_i32_0 = arith.constant 0 : i32
    %2 = arith.cmpi ne, %1, %c0_i32_0 : i32
    scf.if %2 {
      %cst_8 = arith.constant 0.000000e+00 : f32
      %12 = vector.broadcast %cst_8 : f32 to vector<1x32xf32>
      %c0_9 = arith.constant 0 : index
      %c0_10 = arith.constant 0 : index
      %13 = vector.load %arg4[%c0_9, %c0_10] : memref<1x32xf32, #tpu.memory_space<vmem>>, vector<1x32xf32>
      tpu.vector_store %arg4[%c0_9, %c0_10], %12 {strides = array<i32>} : memref<1x32xf32, #tpu.memory_space<vmem>>, vector<1x32xf32>,
    } else {
    }
    %c0 = arith.constant 0 : index
    %c0_1 = arith.constant 0 : index
    %3 = vector.load %arg4[%c0, %c0_1] : memref<1x32xf32, #tpu.memory_space<vmem>>, vector<1x32xf32>
    %c0_2 = arith.constant 0 : index
    %c0_3 = arith.constant 0 : index
    %4 = vector.load %arg2[%c0_2, %c0_3] : memref<16x32xf32, #tpu.memory_space<vmem>>, vector<16x32xf32>
    %cst = arith.constant dense<0.000000e+00> : vector<32xf32>
    %5 = vector.multi_reduction <add>, %4, %cst [0] : vector<16x32xf32> to vector<32xf32>
    %6 = vector.shape_cast %5 : vector<32xf32> to vector<1x32xf32>
    %7 = arith.addf %3, %6 : vector<1x32xf32>
    %c0_4 = arith.constant 0 : index
    %c0_5 = arith.constant 0 : index
    %8 = vector.load %arg4[%c0_4, %c0_5] : memref<1x32xf32, #tpu.memory_space<vmem>>, vector<1x32xf32>
    tpu.vector_store %arg4[%c0_4, %c0_5], %7 {strides = array<i32>} : memref<1x32xf32, #tpu.memory_space<vmem>>, vector<1x32xf32>,
    %c0_i32_6 = arith.constant 0 : i32
    %9 = arith.cmpi eq, %arg1, %c0_i32_6 : i32
    %10 = arith.extui %9 : i1 to i32
    %c0_i32_7 = arith.constant 0 : i32
    %11 = arith.cmpi ne, %10, %c0_i32_7 : i32
    scf.if %11 {
      %c0_8 = arith.constant 0 : index
      %c0_9 = arith.constant 0 : index
      %12 = vector.load %arg4[%c0_8, %c0_9] : memref<1x32xf32, #tpu.memory_space<vmem>>, vector<1x32xf32>
      %c0_10 = arith.constant 0 : index
      %c0_11 = arith.constant 0 : index
      %13 = vector.load %arg3[%c0_10, %c0_11] : memref<1x32xf32, #tpu.memory_space<vmem>>, vector<1x32xf32>
      tpu.vector_store %arg3[%c0_10, %c0_11], %12 {strides = array<i32>} : memref<1x32xf32, #tpu.memory_space<vmem>>, vector<1x32xf32>,
    } else {
    }
    return
  }
  func.func @transform_0(%arg0: i32, %arg1: i32) -> (i32, i32) {
    %c0_i32 = arith.constant 0 : i32
    return %arg1, %arg0 : i32, i32
  }
  func.func @transform_1(%arg0: i32, %arg1: i32) -> (i32, i32) {
    %c0_i32 = arith.constant 0 : i32
    %c0_i32_0 = arith.constant 0 : i32
    return %c0_i32, %arg0 : i32, i32
  }
}

</mosaic_0001>

<bundles_post_ra>
// kernel: tpu_custom_call.1
= control target key start
LH: loop header
LB: loop body
LE: loop exit
PB: predicated region body
PF: predicated region fallthrough
CT: control target
= control target key end

     0   :  { %6 = vsyncpa [#allocation4], 0  ;;  %s138_s0 = inlined_call_operand.hbm [shape: f32[16,32], index: 0, kind: input, shape index: {}]   ;;  %s139_s1 = inlined_call_operand.hbm [shape: f32[1,32], index: 1, kind: output, shape index: {}]  }
   0x1   :  { %7 = vsyncpa [#allocation5], 0  ;;  %s114_s6 = smov [#allocation3]  }
   0x2   :  { %s13_s7 = sshll.u32 %s114_s6, 4  ;;  %s14_s7 = int_to_ptr.vmem [resolvable:$true] %s13_s7 }
   0x3   :  { %s78_s8 = scalar_lea.vmem %s14_s7, 256  ;;  %p83_p1 = scmp.lt.s32.totalorder %s14_s7, %s14_s7 }
   0x4   :  { %p79_p0 = scmp.ne.s32.totalorder %s14_s7, %s78_s8  ;;  %p84_p2 = scmp.lt.s32.totalorder %s78_s8, %s78_s8 }
   0x6   :  { %p85_p3 = por %p84_p2, %p83_p1 }
   0x8   :  { %p86_p4 = pnand %p85_p3, %p79_p0 }
   0xa   :  { %89 = shalt.err (!%p86_p4)
}
   0xb   :  { %s115_s9 = smov 128   ;;  %s116_s10 = smov 8  }
   0xc   :  { %19 = dma.hbm_to_vmem [thread:$0]  %s138_s0, 256, %s14_s7, [#allocation4], %s115_s9, %s115_s9, %s116_s10  }
   0xd   :  { %110 = dma.done.wait [#allocation4], 256  }
   0xe   :  { %111 = vsyncadd [#allocation4], 4294967040  ;;  %vm27_vm0 = vcmask 253952   ;;  %v117_v0 = vmov 0.0   ;;  %vm32_vm1 = vcmask 261120   ;;  %v30_v1 = vld [vmem:[#allocation3] sm:$0xff] }
   0xf   :  { %28 = vst.msk [vmem:[#allocation2] sm:$0x1] %vm27_vm0, %v117_v0  ;;  %v31_v2 = vld [vmem:[#allocation3 + $0x8] sm:$0xff]  ;;  %v33_v3 = vsel %vm32_vm1, %v30_v1, 0.0  ;;  %s118_s0 = smov [#allocation6]  }
  0x10   :  { %v34_v4 = vsel %vm32_vm1, %v31_v2, 0.0  ;;  %s56_s13 = sshll.u32 %s118_s0, 4  ;;  %s57_s13 = int_to_ptr.vmem [resolvable:$true] %s56_s13 }
  0x11   :  { %v35_v5 = vadd.f32 %v34_v4, %v33_v3  ;;  %s90_s14 = scalar_lea.vmem %s57_s13, 16  ;;  %s94_s15 = scalar_lea.vmem %s57_s13, 32 }
  0x12   :  { %p91_p5 = scmp.ne.s32.totalorder %s57_s13, %s90_s14  ;;  %p95_p6 = scmp.lt.s32.totalorder %s57_s13, %s57_s13 }
  0x13   :  { %v36_v6 = vrot.slane %v35_v5, 4  ;;  %p96_p7 = scmp.lt.s32.totalorder %s94_s15, %s90_s14 }
  0x15   :  { %v37_v7 = vadd.f32 %v36_v6, %v35_v5  ;;  %p97_p8 = por %p96_p7, %p95_p6 }
  0x16   :  { %v29_v11 = vld [vmem:[#allocation2] sm:$0x1] }
  0x17   :  { %v38_v8 = vrot.slane %v37_v7, 2  ;;  %p98_p9 = pnand %p97_p8, %p91_p5 }
  0x19   :  { %v39_v9 = vadd.f32 %v38_v8, %v37_v7 }
  0x1b   :  { %v40_v10 = vrot.slane %v39_v9, 1 }
  0x1d   :  { %v41_v12 = vadd.f32 %v40_v10, %v39_v9 }
  0x1f   :  { %v42_v13 = vadd.f32 %v41_v12, %v29_v11 }
  0x21   :  { %44 = vst.msk [vmem:[#allocation2] sm:$0x1] %vm27_vm0, %v42_v13 }
  0x28   :  { %v48_v14 = vld [vmem:[#allocation2] sm:$0x1] }
  0x29   :  { %49 = vst.msk [vmem:[#allocation6] sm:$0x1] %vm27_vm0, %v48_v14 }
  0x2a   :  { %101 = shalt.err (!%p98_p9)
}
  0x2b   :  { %59 = dma.vmem_to_hbm [thread:$0]  %s57_s13, 16, %s139_s1, [#allocation5]  }
  0x2c   :  { %112 = dma.done.wait [#allocation5], 16  }
  0x2d   :  { %113 = vsyncadd [#allocation5], 4294967280 }
  0x2e   :  { %63 = vsyncpa [#allocation4], 1 }
  0x2f   :  { %64 = vsyncpa [#allocation5], 1 }

</bundles_post_ra>
